<compile_context>
chip_gen: v5e
topology: v5e:2x2
jax: 0.10.0
libtpu: 0.0.40
codegen_flags: <defaults>
</compile_context>

<pallas_src>
import functools

import jax
import jax.numpy as jnp
from jax.experimental import pallas as pl
from jax.experimental.pallas import tpu as pltpu

_LANE = 128
_MAX_TB = 2048  # rows per batch tile cap; a few MB of VMEM at most, well under limits


def _round_up(n, m):
    return ((n + m - 1) // m) * m


def _pad_to(a, shape):
    """Zero-pad a 2-D array up to `shape` (no-op if already that shape)."""
    pads = [(0, t - s) for s, t in zip(a.shape, shape)]
    if any(p for _, p in pads):
        a = jnp.pad(a, pads)
    return a


# ---------------------------------------------------------------------------
# Kernels
# ---------------------------------------------------------------------------
def _mlp_kernel(x_ref, w1_ref, b1_ref, w2_ref, b2_ref, w3_ref, b3_ref, o_ref, *, actor):
    h1 = jnp.maximum(
        jnp.dot(x_ref[...], w1_ref[...], preferred_element_type=jnp.float32) + b1_ref[...], 0.0)
    h2 = jnp.maximum(
        jnp.dot(h1, w2_ref[...], preferred_element_type=jnp.float32) + b2_ref[...], 0.0)
    h3 = jnp.dot(h2, w3_ref[...], preferred_element_type=jnp.float32) + b3_ref[...]
    if actor:
        h3 = jnp.tanh(h3)
    o_ref[...] = h3.astype(o_ref.dtype)


def _mlp_dual_kernel(x_ref, w1_ref, b1_ref, w2_ref, b2_ref, w3_ref, b3_ref,
                     o_critic_ref, o_actor_ref):
    # Compute trunk once, emit both heads (critic: raw fc3, actor: tanh(fc3)).
    h1 = jnp.maximum(
        jnp.dot(x_ref[...], w1_ref[...], preferred_element_type=jnp.float32) + b1_ref[...], 0.0)
    h2 = jnp.maximum(
        jnp.dot(h1, w2_ref[...], preferred_element_type=jnp.float32) + b2_ref[...], 0.0)
    h3 = jnp.dot(h2, w3_ref[...], preferred_element_type=jnp.float32) + b3_ref[...]
    o_critic_ref[...] = h3.astype(o_critic_ref.dtype)
    o_actor_ref[...] = jnp.tanh(h3).astype(o_actor_ref.dtype)


# ---------------------------------------------------------------------------
# Wrapper helpers
# ---------------------------------------------------------------------------
def _batch_tiling(B):
    """Pick the batch tile size.

    * B <= 128: one full-array block (per-call overhead dominates; splitting can't help).
    * B  > 128: >=2 near-even tiles (multiple of 8 rows) so v7x's two TensorCores both get
      work via dimension_semantics=("parallel",), with tiles as large as possible (cap 2048
      rows) to amortize the ~0.35us per-grid-step overhead. The last tile may be ragged;
      Pallas pads the read and drops out-of-bounds writes, so no jnp.pad of x is needed.
    """
    if B <= 128:
        return B
    n_tiles = max(2, pl.cdiv(B, _MAX_TB))
    return _round_up(pl.cdiv(B, n_tiles), 8)


def _prep(x, params):
    w1, b1 = params["w1"], params["b1"]
    w2, b2 = params["w2"], params["b2"]
    w3, b3 = params["w3"], params["b3"]

    in_dim = w1.shape[0]
    out_dim = w3.shape[1]
    h1p = _round_up(w1.shape[1], _LANE)
    h2p = _round_up(w2.shape[1], _LANE)

    # Zero-pad hidden dims to full 128-lane width. Padded h1/h2 columns stay exactly zero
    # (zero weights + zero bias -> relu(0) = 0) so results are unchanged.
    w1 = _pad_to(w1, (in_dim, h1p))
    b1 = _pad_to(b1, (1, h1p))
    w2 = _pad_to(w2, (h1p, h2p))
    b2 = _pad_to(b2, (1, h2p))
    w3 = _pad_to(w3, (h2p, out_dim))

    B = x.shape[0]
    TB = _batch_tiling(B)
    grid = (pl.cdiv(B, TB),)

    x_spec = pl.BlockSpec((TB, in_dim), lambda i: (i, 0))
    resident = lambda a: pl.BlockSpec(a.shape, lambda i: (0, 0))  # weights DMA'd once
    out_spec = pl.BlockSpec((TB, out_dim), lambda i: (i, 0))

    in_specs = [
        x_spec,
        resident(w1), resident(b1),
        resident(w2), resident(b2),
        resident(w3), resident(b3),
    ]
    operands = (x, w1, b1, w2, b2, w3, b3)

    flops = 2 * B * (in_dim * h1p + h1p * h2p + h2p * out_dim)
    weight_bytes = 4 * (w1.size + b1.size + w2.size + b2.size + w3.size + b3.size)
    io_bytes = 4 * B * in_dim
    return operands, in_specs, out_spec, grid, out_dim, flops, weight_bytes, io_bytes


# ---------------------------------------------------------------------------
# Public forward passes
# ---------------------------------------------------------------------------
def network_forward(x, params, *, actor=False):
    """Forward pass matching Network.forward (single head, `actor` selects tanh output)."""
    B = x.shape[0]
    operands, in_specs, out_spec, grid, out_dim, flops, wbytes, iobytes = _prep(x, params)

    out = pl.pallas_call(
        functools.partial(_mlp_kernel, actor=actor),
        out_shape=jax.ShapeDtypeStruct((B, out_dim), jnp.float32),
        grid=grid,
        in_specs=in_specs,
        out_specs=out_spec,
        compiler_params=pltpu.CompilerParams(dimension_semantics=("parallel",)),
        cost_estimate=pl.CostEstimate(
            flops=flops,
            transcendentals=(B * out_dim) if actor else 0,
            bytes_accessed=wbytes + iobytes + 4 * B * out_dim,
        ),
    )(*operands)
    return out


def network_forward_dual(x, params):
    """Fused actor+critic forward: one pallas_call, trunk (fc1/fc2) computed once.
    Returns (critic_out, actor_out). Use this when both heads share weights/inputs."""
    B = x.shape[0]
    operands, in_specs, out_spec, grid, out_dim, flops, wbytes, iobytes = _prep(x, params)

    critic, actor = pl.pallas_call(
        _mlp_dual_kernel,
        out_shape=(
            jax.ShapeDtypeStruct((B, out_dim), jnp.float32),
            jax.ShapeDtypeStruct((B, out_dim), jnp.float32),
        ),
        grid=grid,
        in_specs=in_specs,
        out_specs=(out_spec, out_spec),
        compiler_params=pltpu.CompilerParams(dimension_semantics=("parallel",)),
        cost_estimate=pl.CostEstimate(
            flops=flops,
            transcendentals=B * out_dim,
            bytes_accessed=wbytes + iobytes + 8 * B * out_dim,
        ),
    )(*operands)
    return critic, actor


# ---------------------------------------------------------------------------
# Init + reference
# ---------------------------------------------------------------------------
def init_params(key, input_dim, hidden_in_dim, hidden_out_dim, output_dim):
    """Deterministic init mirroring nn.Linear-style U(-1/sqrt(fan_in), 1/sqrt(fan_in))."""
    ks = jax.random.split(key, 6)

    def linear(kw, kb, fan_in, fan_out):
        lim = 1.0 / jnp.sqrt(jnp.float32(fan_in))
        w = jax.random.uniform(kw, (fan_in, fan_out), jnp.float32, -lim, lim)
        b = jax.random.uniform(kb, (1, fan_out), jnp.float32, -lim, lim)
        return w, b

    w1, b1 = linear(ks[0], ks[1], input_dim, hidden_in_dim)
    w2, b2 = linear(ks[2], ks[3], hidden_in_dim, hidden_out_dim)
    w3, b3 = linear(ks[4], ks[5], hidden_out_dim, output_dim)
    return dict(w1=w1, b1=b1, w2=w2, b2=b2, w3=w3, b3=b3)


def _reference_forward(x, params, *, actor=False):
    h1 = jnp.maximum(x @ params["w1"] + params["b1"], 0.0)
    h2 = jnp.maximum(h1 @ params["w2"] + params["b2"], 0.0)
    h3 = h2 @ params["w3"] + params["b3"]
    return jnp.tanh(h3) if actor else h3


if __name__ == "__main__":
    key = jax.random.PRNGKey(0)
    k_x, k_x2, k_x3, k_p = jax.random.split(key, 4)

    batch = 8
    input_dim, hidden_in_dim, hidden_out_dim, output_dim = 24, 64, 32, 4

    x = jax.random.normal(k_x, (batch, input_dim), dtype=jnp.float32)
    params = init_params(k_p, input_dim, hidden_in_dim, hidden_out_dim, output_dim)

    # --- single-head API (matches Network.forward semantics) ---
    out_critic = jax.block_until_ready(network_forward(x, params, actor=False))
    out_actor = jax.block_until_ready(network_forward(x, params, actor=True))

    ref_critic = _reference_forward(x, params, actor=False)
    ref_actor = _reference_forward(x, params, actor=True)

    assert out_critic.shape == (batch, output_dim)
    assert out_actor.shape == (batch, output_dim)
    assert jnp.allclose(out_critic, ref_critic, atol=1e-5, rtol=1e-5)
    assert jnp.allclose(out_actor, ref_actor, atol=1e-5, rtol=1e-5)

    # --- fused dual-head call (amortizes trunk + weight DMAs over both heads) ---
    dual_critic, dual_actor = network_forward_dual(x, params)
    jax.block_until_ready((dual_critic, dual_actor))
    assert jnp.allclose(dual_critic, ref_critic, atol=1e-5, rtol=1e-5)
    assert jnp.allclose(dual_actor, ref_actor, atol=1e-5, rtol=1e-5)

    # --- ragged batch, 2 tiles (exercises grid>1 + ragged last tile, no x padding) ---
    mid_batch = 300
    x_mid = jax.random.normal(k_x2, (mid_batch, input_dim), dtype=jnp.float32)
    out_mid = jax.block_until_ready(network_forward(x_mid, params, actor=True))
    ref_mid = _reference_forward(x_mid, params, actor=True)
    assert out_mid.shape == (mid_batch, output_dim)
    assert jnp.allclose(out_mid, ref_mid, atol=1e-5, rtol=1e-5)

    # --- larger batch (bigger tiles, ragged tail, dual head) ---
    big_batch = 1500
    x_big = jax.random.normal(k_x3, (big_batch, input_dim), dtype=jnp.float32)
    big_critic, big_actor = network_forward_dual(x_big, params)
    jax.block_until_ready((big_critic, big_actor))
    assert big_critic.shape == (big_batch, output_dim)
    assert jnp.allclose(big_critic, _reference_forward(x_big, params, actor=False),
                        atol=1e-5, rtol=1e-5)
    assert jnp.allclose(big_actor, _reference_forward(x_big, params, actor=True),
                        atol=1e-5, rtol=1e-5)

    print("KERNEL_OK")
</pallas_src>

<mosaic_0001>
module attributes {stable_mosaic.version = 11 : i64} {
  func.func @_mlp_kernel(%arg0: i32, %arg1: memref<8x24xf32, #tpu.memory_space<vmem>>, %arg2: memref<24x128xf32, #tpu.memory_space<vmem>>, %arg3: memref<1x128xf32, #tpu.memory_space<vmem>>, %arg4: memref<128x128xf32, #tpu.memory_space<vmem>>, %arg5: memref<1x128xf32, #tpu.memory_space<vmem>>, %arg6: memref<128x4xf32, #tpu.memory_space<vmem>>, %arg7: memref<1x4xf32, #tpu.memory_space<vmem>>, %arg8: memref<8x4xf32, #tpu.memory_space<vmem>>) attributes {dimension_semantics = [#tpu.dimension_semantics<parallel>], iteration_bounds = array<i64: 1>, scalar_prefetch = 0 : i64, scratch_operands = 0 : i64, tpu.core_type = #tpu.core_type<tc>, window_params = [{transform_indices = @transform_0, window_bounds = array<i64: 8, 24>}, {pipeline_mode = #tpu.pipeline_mode<synchronous>, transform_indices = @transform_1, window_bounds = array<i64: 24, 128>}, {pipeline_mode = #tpu.pipeline_mode<synchronous>, transform_indices = @transform_2, window_bounds = array<i64: 1, 128>}, {pipeline_mode = #tpu.pipeline_mode<synchronous>, transform_indices = @transform_3, window_bounds = array<i64: 128, 128>}, {pipeline_mode = #tpu.pipeline_mode<synchronous>, transform_indices = @transform_4, window_bounds = array<i64: 1, 128>}, {pipeline_mode = #tpu.pipeline_mode<synchronous>, transform_indices = @transform_5, window_bounds = array<i64: 128, 4>}, {pipeline_mode = #tpu.pipeline_mode<synchronous>, transform_indices = @transform_6, window_bounds = array<i64: 1, 4>}, {transform_indices = @transform_7, window_bounds = array<i64: 8, 4>}]} {
    %c0 = arith.constant 0 : index
    %c0_0 = arith.constant 0 : index
    %0 = vector.load %arg1[%c0, %c0_0] : memref<8x24xf32, #tpu.memory_space<vmem>>, vector<8x24xf32>
    %c0_1 = arith.constant 0 : index
    %c0_2 = arith.constant 0 : index
    %1 = vector.load %arg2[%c0_1, %c0_2] : memref<24x128xf32, #tpu.memory_space<vmem>>, vector<24x128xf32>
    %cst = arith.constant dense<0.000000e+00> : vector<8x128xf32>
    %2 = tpu.matmul %0, %1, %cst {dimension_numbers = #tpu.dot_dimension_numbers<[1], [0], [0], [1], [0, 0, 1, 1], [], []>} : vector<8x24xf32>, vector<24x128xf32>, vector<8x128xf32> -> vector<8x128xf32>
    %c0_3 = arith.constant 0 : index
    %c0_4 = arith.constant 0 : index
    %3 = vector.load %arg3[%c0_3, %c0_4] : memref<1x128xf32, #tpu.memory_space<vmem>>, vector<1x128xf32>
    %4 = vector.broadcast %3 : vector<1x128xf32> to vector<8x128xf32>
    %5 = arith.addf %2, %4 : vector<8x128xf32>
    %cst_5 = arith.constant 0.000000e+00 : f32
    %6 = vector.broadcast %cst_5 : f32 to vector<8x128xf32>
    %7 = arith.maximumf %5, %6 : vector<8x128xf32>
    %c0_6 = arith.constant 0 : index
    %c0_7 = arith.constant 0 : index
    %8 = vector.load %arg4[%c0_6, %c0_7] : memref<128x128xf32, #tpu.memory_space<vmem>>, vector<128x128xf32>
    %cst_8 = arith.constant dense<0.000000e+00> : vector<8x128xf32>
    %9 = tpu.matmul %7, %8, %cst_8 {dimension_numbers = #tpu.dot_dimension_numbers<[1], [0], [0], [1], [0, 0, 1, 1], [], []>} : vector<8x128xf32>, vector<128x128xf32>, vector<8x128xf32> -> vector<8x128xf32>
    %c0_9 = arith.constant 0 : index
    %c0_10 = arith.constant 0 : index
    %10 = vector.load %arg5[%c0_9, %c0_10] : memref<1x128xf32, #tpu.memory_space<vmem>>, vector<1x128xf32>
    %11 = vector.broadcast %10 : vector<1x128xf32> to vector<8x128xf32>
    %12 = arith.addf %9, %11 : vector<8x128xf32>
    %cst_11 = arith.constant 0.000000e+00 : f32
    %13 = vector.broadcast %cst_11 : f32 to vector<8x128xf32>
    %14 = arith.maximumf %12, %13 : vector<8x128xf32>
    %c0_12 = arith.constant 0 : index
    %c0_13 = arith.constant 0 : index
    %15 = vector.load %arg6[%c0_12, %c0_13] : memref<128x4xf32, #tpu.memory_space<vmem>>, vector<128x4xf32>
    %cst_14 = arith.constant dense<0.000000e+00> : vector<8x4xf32>
    %16 = tpu.matmul %14, %15, %cst_14 {dimension_numbers = #tpu.dot_dimension_numbers<[1], [0], [0], [1], [0, 0, 1, 1], [], []>} : vector<8x128xf32>, vector<128x4xf32>, vector<8x4xf32> -> vector<8x4xf32>
    %c0_15 = arith.constant 0 : index
    %c0_16 = arith.constant 0 : index
    %17 = vector.load %arg7[%c0_15, %c0_16] : memref<1x4xf32, #tpu.memory_space<vmem>>, vector<1x4xf32>
    %18 = vector.broadcast %17 : vector<1x4xf32> to vector<8x4xf32>
    %19 = arith.addf %16, %18 : vector<8x4xf32>
    %c0_17 = arith.constant 0 : index
    %c0_18 = arith.constant 0 : index
    %20 = vector.load %arg8[%c0_17, %c0_18] : memref<8x4xf32, #tpu.memory_space<vmem>>, vector<8x4xf32>
    tpu.vector_store %arg8[%c0_17, %c0_18], %19 {strides = array<i32>} : memref<8x4xf32, #tpu.memory_space<vmem>>, vector<8x4xf32>,
    return
  }
  func.func @transform_0(%arg0: i32) -> (i32, i32) {
    %c0_i32 = arith.constant 0 : i32
    %c0_i32_0 = arith.constant 0 : i32
    return %arg0, %c0_i32 : i32, i32
  }
  func.func @transform_1(%arg0: i32) -> (i32, i32) {
    %c0_i32 = arith.constant 0 : i32
    %c0_i32_0 = arith.constant 0 : i32
    %c0_i32_1 = arith.constant 0 : i32
    return %c0_i32, %c0_i32_0 : i32, i32
  }
  func.func @transform_2(%arg0: i32) -> (i32, i32) {
    %c0_i32 = arith.constant 0 : i32
    %c0_i32_0 = arith.constant 0 : i32
    %c0_i32_1 = arith.constant 0 : i32
    return %c0_i32, %c0_i32_0 : i32, i32
  }
  func.func @transform_3(%arg0: i32) -> (i32, i32) {
    %c0_i32 = arith.constant 0 : i32
    %c0_i32_0 = arith.constant 0 : i32
    %c0_i32_1 = arith.constant 0 : i32
    return %c0_i32, %c0_i32_0 : i32, i32
  }
  func.func @transform_4(%arg0: i32) -> (i32, i32) {
    %c0_i32 = arith.constant 0 : i32
    %c0_i32_0 = arith.constant 0 : i32
    %c0_i32_1 = arith.constant 0 : i32
    return %c0_i32, %c0_i32_0 : i32, i32
  }
  func.func @transform_5(%arg0: i32) -> (i32, i32) {
    %c0_i32 = arith.constant 0 : i32
    %c0_i32_0 = arith.constant 0 : i32
    %c0_i32_1 = arith.constant 0 : i32
    return %c0_i32, %c0_i32_0 : i32, i32
  }
  func.func @transform_6(%arg0: i32) -> (i32, i32) {
    %c0_i32 = arith.constant 0 : i32
    %c0_i32_0 = arith.constant 0 : i32
    %c0_i32_1 = arith.constant 0 : i32
    return %c0_i32, %c0_i32_0 : i32, i32
  }
  func.func @transform_7(%arg0: i32) -> (i32, i32) {
    %c0_i32 = arith.constant 0 : i32
    %c0_i32_0 = arith.constant 0 : i32
    return %arg0, %c0_i32 : i32, i32
  }
}

</mosaic_0001>

<bundles_post_ra>
// kernel: tpu_custom_call.1
= control target key start
LH: loop header
LB: loop body
LE: loop exit
PB: predicated region body
PF: predicated region fallthrough
CT: control target
= control target key end

     0   :  { %12 = vsyncpa [#allocation3], 0  ;;  %s396_s0 = inlined_call_operand.hbm [shape: f32[8,24], index: 0, kind: input, shape index: {}]   ;;  %s397_s1 = inlined_call_operand.hbm [shape: f32[24,128], index: 1, kind: input, shape index: {}]   ;;  %s398_s2 = inlined_call_operand.vmem [shape: f32[1,128], index: 2, kind: input, shape index: {}]   ;;  %s399_s3 = inlined_call_operand.vmem [shape: f32[128,128], index: 3, kind: input, shape index: {}]   ;;  %s400_s4 = inlined_call_operand.vmem [shape: f32[1,128], index: 4, kind: input, shape index: {}]   ;;  %s401_s5 = inlined_call_operand.vmem [shape: f32[128,4], index: 5, kind: input, shape index: {}]   ;;  %s402_s6 = inlined_call_operand.vmem [shape: f32[1,4], index: 6, kind: input, shape index: {}]   ;;  %s403_s7 = inlined_call_operand.vmem [shape: f32[8,4], index: 7, kind: output, shape index: {}]  }
   0x1   :  { %s19_s26 = sshll.u32 %s396_s0, 4  ;;  %s20_s26 = int_to_ptr.hbm [resolvable:$true] %s19_s26 }
   0x2   :  { %13 = vsyncpa [#allocation5], 0  ;;  %s238_s27 = smov [#allocation2]   ;;  %s29_s8 = sshll.u32 %s397_s1, 4  ;;  %s30_s8 = int_to_ptr.hbm [resolvable:$true] %s29_s8 }
   0x3   :  { %s21_s28 = sshll.u32 %s238_s27, 4  ;;  %s239_s9 = smov [#allocation4]   ;;  %s22_s28 = int_to_ptr.vmem [resolvable:$true] %s21_s28 }
   0x4   :  { %24 = dma.hbm_to_vmem [thread:$0]  %s20_s26, 128, %s22_s28, [#allocation3]  }
   0x5   :  { %s31_s10 = sshll.u32 %s239_s9, 4  ;;  %s240_s11 = smov 128   ;;  %s32_s10 = int_to_ptr.vmem [resolvable:$true] %s31_s10 }
   0x6   :  { %s241_s12 = smov 8  }
   0x7   :  { %37 = dma.hbm_to_vmem [thread:$0]  %s30_s8, 384, %s32_s10, [#allocation5], %s240_s11, %s240_s11, %s241_s12  }
   0x8   :  { %234 = dma.done.wait [#allocation3], 128  }
   0x9   :  { %235 = vsyncadd [#allocation3], 4294967168 }
   0xa   :  { %236 = dma.done.wait [#allocation5], 384  }
   0xb   :  { %237 = vsyncadd [#allocation5], 4294966912  ;;  %v59_v0 = vld [vmem:[#allocation4 + $0x10] sm:$0xff]  ;;  %v58_v1 = vld [vmem:[#allocation4 + $0x8] sm:$0xff]  ;;  %vm64_vm0 = vcmask 195584   ;;  %vm170_vm1 = vcmask 31744  }
   0xc   :  { %81 = vmatpush.msra.mxu0 %v59_v0  ;;  %v104_v2 = vld [vmem:[%s399_s3 + $0x78] sm:$0xff]  ;;  %v103_v3 = vld [vmem:[%s399_s3 + $0x70] sm:$0xff]  ;;  %v57_v4 = vld [vmem:[#allocation4] sm:$0xff] }
   0xd   :  { %109 = vmatpush.msra.mxu1 %v104_v2  ;;  %v56_v5 = vld [vmem:[#allocation2] sm:$0xff]  ;;  %v102_v6 = vld [vmem:[%s399_s3 + $0x68] sm:$0xff]  ;;  %v100_v8 = vld [vmem:[%s399_s3 + $0x58] sm:$0xff] }
   0xe   :  { %82 = vmatpush.msra.mxu0 %v58_v1  ;;  %v101_v7 = vld [vmem:[%s399_s3 + $0x60] sm:$0xff]  ;;  %v99_v9 = vld [vmem:[%s399_s3 + $0x50] sm:$0xff]  ;;  %v98_v10 = vld [vmem:[%s399_s3 + $0x48] sm:$0xff] }
   0xf   :  { %110 = vmatpush.msra.mxu1 %v103_v3  ;;  %v97_v11 = vld [vmem:[%s399_s3 + $0x40] sm:$0xff]  ;;  %v96_v12 = vld [vmem:[%s399_s3 + $0x38] sm:$0xff]  ;;  %v95_v13 = vld [vmem:[%s399_s3 + $0x30] sm:$0xff] }
  0x10   :  { %83 = vmatpush.msra.mxu0 %v57_v4  ;;  %v94_v14 = vld [vmem:[%s399_s3 + $0x28] sm:$0xff]  ;;  %v93_v15 = vld [vmem:[%s399_s3 + $0x20] sm:$0xff]  ;;  %v92_v16 = vld [vmem:[%s399_s3 + $0x18] sm:$0xff] }
  0x11   :  { %178 = vmatmul.msk.f32.vlgmr.msra.gmra.mxu0 %vm64_vm0, %v56_v5  ;;  %111 = vmatpush.msra.mxu1 %v102_v6  ;;  %v91_v17 = vld [vmem:[%s399_s3 + $0x10] sm:$0xff]  ;;  %v90_v18 = vld [vmem:[%s399_s3 + $0x8] sm:$0xff]  ;;  %v89_v19 = vld [vmem:[%s399_s3] sm:$0xff] }
  0x12   :  { %v145_v20 = vld [vmem:[%s401_s5 + $0x78] sm:$0xff]  ;;  %v144_v21 = vld [vmem:[%s401_s5 + $0x70] sm:$0xff]  ;;  %v143_v22 = vld [vmem:[%s401_s5 + $0x68] sm:$0xff] }
  0x13   :  { %112 = vmatpush.msra.mxu1 %v101_v7  ;;  %150 = vmatpush.msra.mxu2 %v145_v20  ;;  %v142_v23 = vld [vmem:[%s401_s5 + $0x60] sm:$0xff]  ;;  %v141_v24 = vld [vmem:[%s401_s5 + $0x58] sm:$0xff]  ;;  %v140_v25 = vld [vmem:[%s401_s5 + $0x50] sm:$0xff] }
  0x14   :  { %v139_v26 = vld [vmem:[%s401_s5 + $0x48] sm:$0xff]  ;;  %v138_v27 = vld [vmem:[%s401_s5 + $0x40] sm:$0xff]  ;;  %v137_v28 = vld [vmem:[%s401_s5 + $0x38] sm:$0xff] }
  0x15   :  { %113 = vmatpush.msra.mxu1 %v100_v8  ;;  %151 = vmatpush.msra.mxu2 %v144_v21  ;;  %v136_v29 = vld [vmem:[%s401_s5 + $0x30] sm:$0xff]  ;;  %v135_v30 = vld [vmem:[%s401_s5 + $0x28] sm:$0xff]  ;;  %v134_v31 = vld [vmem:[%s401_s5 + $0x20] sm:$0xff] }
  0x16   :  { %v133_v32 = vld [vmem:[%s401_s5 + $0x18] sm:$0xff]  ;;  %v183_v33 = vld [vmem:[%s398_s2] ss:$0 sm:$0xff]  ;;  %v132_v37 = vld [vmem:[%s401_s5 + $0x10] sm:$0xff] }
  0x17   :  { %114 = vmatpush.msra.mxu1 %v99_v9  ;;  %152 = vmatpush.msra.mxu2 %v143_v22  ;;  %v131_v38 = vld [vmem:[%s401_s5 + $0x8] sm:$0xff]  ;;  %v130_v39 = vld [vmem:[%s401_s5] sm:$0xff] }
  0x18   :  { %v184_v40 = vld [vmem:[%s400_s4] ss:$0 sm:$0xff] }
  0x19   :  { %115 = vmatpush.msra.mxu1 %v98_v10  ;;  %153 = vmatpush.msra.mxu2 %v142_v23  ;;  %v185_v44 = vld [vmem:[%s402_s6] ss:$0 sm:$0xff] }
  0x1b   :  { %116 = vmatpush.msra.mxu1 %v97_v11  ;;  %154 = vmatpush.msra.mxu2 %v141_v24 }
  0x1d   :  { %117 = vmatpush.msra.mxu1 %v96_v12  ;;  %155 = vmatpush.msra.mxu2 %v140_v25 }
  0x1f   :  { %118 = vmatpush.msra.mxu1 %v95_v13  ;;  %156 = vmatpush.msra.mxu2 %v139_v26 }
  0x21   :  { %119 = vmatpush.msra.mxu1 %v94_v14  ;;  %157 = vmatpush.msra.mxu2 %v138_v27 }
  0x23   :  { %120 = vmatpush.msra.mxu1 %v93_v15  ;;  %158 = vmatpush.msra.mxu2 %v137_v28 }
  0x25   :  { %121 = vmatpush.msra.mxu1 %v92_v16  ;;  %159 = vmatpush.msra.mxu2 %v136_v29 }
  0x27   :  { %122 = vmatpush.msra.mxu1 %v91_v17  ;;  %160 = vmatpush.msra.mxu2 %v135_v30 }
  0x29   :  { %123 = vmatpush.msra.mxu1 %v90_v18  ;;  %161 = vmatpush.msra.mxu2 %v134_v31 }
  0x2b   :  { %124 = vmatpush.msra.mxu1 %v89_v19  ;;  %162 = vmatpush.msra.mxu2 %v133_v32 }
  0x2d   :  { %163 = vmatpush.msra.mxu2 %v132_v37 }
  0x2f   :  { %164 = vmatpush.msra.mxu2 %v131_v38 }
  0x31   :  { %165 = vmatpush.msra.mxu2 %v130_v39 }
  0x8e   :  { %v85_v34 = vpop.f32.mrf.mxu0 }
  0x8f   :  { %v86_v35 = vadd.f32 %v183_v33, %v85_v34 }
  0x91   :  { %v88_v36 = vmax.f32 %v86_v35, 0.0 }
  0x93   :  { %125 = vmatmul.f32.vlgmr.msra.gmra.mxu1 %v88_v36 }
 0x110   :  { %v126_v41 = vpop.f32.mrf.mxu1 }
 0x111   :  { %v127_v42 = vadd.f32 %v184_v40, %v126_v41 }
 0x113   :  { %v129_v43 = vmax.f32 %v127_v42, 0.0 }
 0x115   :  { %166 = vmatmul.f32.vlgmr.msra.gmra.mxu2 %v129_v43 }
 0x198   :  { %v167_v45 = vpop.f32.mrf.mxu2 }
 0x199   :  { %v168_v46 = vadd.f32 %v185_v44, %v167_v45 }
 0x19b   :  { %171 = vst.msk [vmem:[%s403_s7] sm:$0xff] %vm170_vm1, %v168_v46 }
 0x19c   :  { %176 = vsyncpa [#allocation3], 1 }
 0x19d   :  { %177 = vsyncpa [#allocation5], 1 }

</bundles_post_ra>
